<compile_context>
chip_gen: v5e
topology: v5e:2x2
jax: 0.10.0
libtpu: 0.0.40
codegen_flags: <defaults>
</compile_context>

<pallas_src>
import jax
import jax.numpy as jnp
from jax.experimental import pallas as pl
from jax.experimental.pallas import tpu as pltpu

LANE = 128       # TPU lane width
SUBLANE = 8      # TPU sublane width


def _round_up(x, m):
    return (x + m - 1) // m * m


# ----------------------------- Pallas kernel ------------------------------ #

def _mlp_kernel(x_ref, w1_ref, b1_ref, w2_ref, b2_ref, o_ref):
    # f32 -> bf16 cast on the VPU; hidden under the input DMA (avoids a
    # separate XLA pad+cast pass over x in HBM).
    x = x_ref[...].astype(jnp.bfloat16)
    # Layer 1: bf16 x bf16 matmul on the MXU with f32 accumulation;
    # bias add + ReLU in f32 on the VPU.  b1 is (1, H_p) -> broadcasts.
    h = jnp.dot(x, w1_ref[...], preferred_element_type=jnp.float32)
    h = jnp.maximum(h + b1_ref[...], 0.0)
    # Layer 2: output width is the *unpadded* f_out, so only useful bytes are
    # written back to HBM (masked vst beats 8x-amplified padded writeback).
    y = jnp.dot(h.astype(jnp.bfloat16), w2_ref[...],
                preferred_element_type=jnp.float32)
    o_ref[...] = (y + b2_ref[...]).astype(o_ref.dtype)


def _pick_batch_tile(batch, block_b):
    """Batch tile: multiple of 8 (sublane), capped at block_b, and chosen so
    the grid has >= 2 steps whenever the batch is big enough to split."""
    b8 = _round_up(batch, SUBLANE)
    if b8 <= 2 * SUBLANE:
        return b8                      # tiny batch -> single tile
    half = _round_up(pl.cdiv(b8, 2), SUBLANE)
    return max(SUBLANE, min(block_b, half))


def mlp_forward(x, w1_p, b1_p, w2_p, b2_p, *, block_b=1024):
    """Fused Linear->ReLU->Linear.

    `w1_p/b1_p/w2_p/b2_p` are pre-padded on the hidden dim only (H -> multiple
    of 128) and pre-cast (weights bf16, biases f32).  `x` is used as-is
    (unpadded, any float dtype); the output is exactly (B, f_out) float32 —
    no wrapper-side pad, cast, or slice ops.
    """
    B, f_in = x.shape
    f_in_w, h_p = w1_p.shape
    assert f_in == f_in_w, "x feature dim must match w1"
    f_out = w2_p.shape[1]

    tb = _pick_batch_tile(B, block_b)
    grid = (pl.cdiv(B, tb),)           # ragged last block handled by Pallas

    return pl.pallas_call(
        _mlp_kernel,
        out_shape=jax.ShapeDtypeStruct((B, f_out), jnp.float32),
        grid_spec=pl.GridSpec(
            grid=grid,
            in_specs=[
                # x: tiled over batch; last dim = full array dim (legal).
                pl.BlockSpec((tb, f_in), lambda i: (i, 0)),
                # weights / biases: same tiny block every step -> VMEM-resident.
                pl.BlockSpec((f_in, h_p), lambda i: (0, 0)),
                pl.BlockSpec((1, h_p), lambda i: (0, 0)),
                pl.BlockSpec((h_p, f_out), lambda i: (0, 0)),
                pl.BlockSpec((1, f_out), lambda i: (0, 0)),
            ],
            # Output block: narrow (f_out) last dim = full array dim (legal).
            out_specs=pl.BlockSpec((tb, f_out), lambda i: (i, 0)),
        ),
        compiler_params=pltpu.CompilerParams(
            # Batch tiles are independent.  (pltpu.CORE_PARALLEL would be the
            # explicit 2-TC lever on v7x; "parallel" kept for portability.)
            dimension_semantics=("parallel",),
            # Per-step buffers are < 0.5 MiB even double-buffered; 32 MiB is
            # safe on v7x's 64 MiB physical VMEM.
            vmem_limit_bytes=32 * 1024 * 1024,
        ),
    )(x, w1_p, b1_p, w2_p, b2_p)


# ----------------------- Module equivalents (glue) ------------------------ #

class InnerMLP:
    """Concrete model to wrap: Linear(32->64) -> ReLU -> Linear(64->16).
    Logical f32 params are kept for the reference check; kernel params are
    padded on the hidden dim to a 128-lane multiple and cast (weights bf16,
    biases f32) once, up front."""

    def __init__(self, key, f_in=32, f_hidden=64, f_out=16):
        k1, k2, k3, k4 = jax.random.split(key, 4)
        self.f_in, self.f_hidden, self.f_out = f_in, f_hidden, f_out

        # torch.nn.Linear stores weight as (out, in); we keep the transposed
        # (in, out) layout so the kernel can do x @ W directly.
        self.w1 = jax.random.normal(k1, (f_in, f_hidden), jnp.float32) * 0.05
        self.b1 = jax.random.normal(k2, (1, f_hidden), jnp.float32) * 0.05
        self.w2 = jax.random.normal(k3, (f_hidden, f_out), jnp.float32) * 0.05
        self.b2 = jax.random.normal(k4, (1, f_out), jnp.float32) * 0.05

        h_p = _round_up(f_hidden, LANE)

        # Zero-padding of the hidden dim keeps the math exact: padded hidden
        # columns are relu(x@0 + 0) = 0 and multiply zero rows of w2.
        # F_in and F_out are NOT padded (full-dim blocks are legal).
        self.w1_p = (jnp.zeros((f_in, h_p), jnp.bfloat16)
                     .at[:, :f_hidden].set(self.w1.astype(jnp.bfloat16)))
        self.b1_p = (jnp.zeros((1, h_p), jnp.float32)
                     .at[:, :f_hidden].set(self.b1))
        self.w2_p = (jnp.zeros((h_p, f_out), jnp.bfloat16)
                     .at[:f_hidden, :].set(self.w2.astype(jnp.bfloat16)))
        self.b2_p = self.b2

    def __call__(self, x):
        return mlp_forward(x, self.w1_p, self.b1_p, self.w2_p, self.b2_p)


class BaseModelWrapper:
    """JAX equivalent of the PyTorch BaseModelWrapper: forward delegates to
    the wrapped model."""
    # TODO(synk): BaseCallback hooks have no Pallas equivalent (host-side
    # training callbacks); only the forward-pass delegation is implemented.

    def __init__(self, model, config, *args, **kwargs):
        self.model = model
        self.config = config

    def forward(self, x):
        return self.model(x)

    __call__ = forward


# --------------------------------- main ----------------------------------- #

if __name__ == "__main__":
    key = jax.random.PRNGKey(0)
    k_params, k_x = jax.random.split(key)

    model = InnerMLP(k_params, f_in=32, f_hidden=64, f_out=16)
    wrapper = BaseModelWrapper(model, config={"name": "synthetic_mlp"})

    B = 32                                            # -> 2 grid steps (TB=16)
    x = jax.random.normal(k_x, (B, 32), jnp.float32)  # [B, F_in]

    out = wrapper(x)
    out = jax.block_until_ready(out)
    assert out.shape == (B, 16)
    assert out.dtype == jnp.float32

    # Reference 1: same bf16-operand / f32-accumulate path as the kernel.
    xb = x.astype(jnp.bfloat16)
    h_ref = jnp.dot(xb, model.w1.astype(jnp.bfloat16),
                    preferred_element_type=jnp.float32) + model.b1
    h_ref = jnp.maximum(h_ref, 0.0).astype(jnp.bfloat16)
    ref_bf16 = jnp.dot(h_ref, model.w2.astype(jnp.bfloat16),
                       preferred_element_type=jnp.float32) + model.b2
    assert jnp.allclose(out, ref_bf16, atol=1e-3, rtol=1e-3)

    # Reference 2: full-f32 math (loose tolerance for the bf16 operand cast).
    ref_f32 = jnp.maximum(x @ model.w1 + model.b1, 0.0) @ model.w2 + model.b2
    assert jnp.allclose(out, ref_f32, atol=5e-2, rtol=5e-2)

    print("KERNEL_OK")
</pallas_src>

<mosaic_0001>
module attributes {stable_mosaic.version = 11 : i64} {
  func.func @_mlp_kernel(%arg0: i32, %arg1: memref<16x32xf32, #tpu.memory_space<vmem>>, %arg2: memref<32x128xbf16, #tpu.memory_space<vmem>>, %arg3: memref<1x128xf32, #tpu.memory_space<vmem>>, %arg4: memref<128x16xbf16, #tpu.memory_space<vmem>>, %arg5: memref<1x16xf32, #tpu.memory_space<vmem>>, %arg6: memref<16x16xf32, #tpu.memory_space<vmem>>) attributes {dimension_semantics = [#tpu.dimension_semantics<parallel>], iteration_bounds = array<i64: 2>, scalar_prefetch = 0 : i64, scratch_operands = 0 : i64, tpu.core_type = #tpu.core_type<tc>, window_params = [{transform_indices = @transform_0, window_bounds = array<i64: 16, 32>}, {pipeline_mode = #tpu.pipeline_mode<synchronous>, transform_indices = @transform_1, window_bounds = array<i64: 32, 128>}, {pipeline_mode = #tpu.pipeline_mode<synchronous>, transform_indices = @transform_2, window_bounds = array<i64: 1, 128>}, {pipeline_mode = #tpu.pipeline_mode<synchronous>, transform_indices = @transform_3, window_bounds = array<i64: 128, 16>}, {pipeline_mode = #tpu.pipeline_mode<synchronous>, transform_indices = @transform_4, window_bounds = array<i64: 1, 16>}, {transform_indices = @transform_5, window_bounds = array<i64: 16, 16>}]} {
    %c0 = arith.constant 0 : index
    %c0_0 = arith.constant 0 : index
    %0 = vector.load %arg1[%c0, %c0_0] : memref<16x32xf32, #tpu.memory_space<vmem>>, vector<16x32xf32>
    %1 = arith.truncf %0 : vector<16x32xf32> to vector<16x32xbf16>
    %c0_1 = arith.constant 0 : index
    %c0_2 = arith.constant 0 : index
    %2 = vector.load %arg2[%c0_1, %c0_2] : memref<32x128xbf16, #tpu.memory_space<vmem>>, vector<32x128xbf16>
    %cst = arith.constant dense<0.000000e+00> : vector<16x128xf32>
    %3 = tpu.matmul %1, %2, %cst {dimension_numbers = #tpu.dot_dimension_numbers<[1], [0], [0], [1], [0, 0, 1, 1], [], []>} : vector<16x32xbf16>, vector<32x128xbf16>, vector<16x128xf32> -> vector<16x128xf32>
    %c0_3 = arith.constant 0 : index
    %c0_4 = arith.constant 0 : index
    %4 = vector.load %arg3[%c0_3, %c0_4] : memref<1x128xf32, #tpu.memory_space<vmem>>, vector<1x128xf32>
    %5 = vector.broadcast %4 : vector<1x128xf32> to vector<16x128xf32>
    %6 = arith.addf %3, %5 : vector<16x128xf32>
    %cst_5 = arith.constant 0.000000e+00 : f32
    %7 = vector.broadcast %cst_5 : f32 to vector<16x128xf32>
    %8 = arith.maximumf %6, %7 : vector<16x128xf32>
    %9 = arith.truncf %8 : vector<16x128xf32> to vector<16x128xbf16>
    %c0_6 = arith.constant 0 : index
    %c0_7 = arith.constant 0 : index
    %10 = vector.load %arg4[%c0_6, %c0_7] : memref<128x16xbf16, #tpu.memory_space<vmem>>, vector<128x16xbf16>
    %cst_8 = arith.constant dense<0.000000e+00> : vector<16x16xf32>
    %11 = tpu.matmul %9, %10, %cst_8 {dimension_numbers = #tpu.dot_dimension_numbers<[1], [0], [0], [1], [0, 0, 1, 1], [], []>} : vector<16x128xbf16>, vector<128x16xbf16>, vector<16x16xf32> -> vector<16x16xf32>
    %c0_9 = arith.constant 0 : index
    %c0_10 = arith.constant 0 : index
    %12 = vector.load %arg5[%c0_9, %c0_10] : memref<1x16xf32, #tpu.memory_space<vmem>>, vector<1x16xf32>
    %13 = vector.broadcast %12 : vector<1x16xf32> to vector<16x16xf32>
    %14 = arith.addf %11, %13 : vector<16x16xf32>
    %c0_11 = arith.constant 0 : index
    %c0_12 = arith.constant 0 : index
    %15 = vector.load %arg6[%c0_11, %c0_12] : memref<16x16xf32, #tpu.memory_space<vmem>>, vector<16x16xf32>
    tpu.vector_store %arg6[%c0_11, %c0_12], %14 {strides = array<i32>} : memref<16x16xf32, #tpu.memory_space<vmem>>, vector<16x16xf32>,
    return
  }
  func.func @transform_0(%arg0: i32) -> (i32, i32) {
    %c0_i32 = arith.constant 0 : i32
    %c0_i32_0 = arith.constant 0 : i32
    return %arg0, %c0_i32 : i32, i32
  }
  func.func @transform_1(%arg0: i32) -> (i32, i32) {
    %c0_i32 = arith.constant 0 : i32
    %c0_i32_0 = arith.constant 0 : i32
    %c0_i32_1 = arith.constant 0 : i32
    return %c0_i32, %c0_i32_0 : i32, i32
  }
  func.func @transform_2(%arg0: i32) -> (i32, i32) {
    %c0_i32 = arith.constant 0 : i32
    %c0_i32_0 = arith.constant 0 : i32
    %c0_i32_1 = arith.constant 0 : i32
    return %c0_i32, %c0_i32_0 : i32, i32
  }
  func.func @transform_3(%arg0: i32) -> (i32, i32) {
    %c0_i32 = arith.constant 0 : i32
    %c0_i32_0 = arith.constant 0 : i32
    %c0_i32_1 = arith.constant 0 : i32
    return %c0_i32, %c0_i32_0 : i32, i32
  }
  func.func @transform_4(%arg0: i32) -> (i32, i32) {
    %c0_i32 = arith.constant 0 : i32
    %c0_i32_0 = arith.constant 0 : i32
    %c0_i32_1 = arith.constant 0 : i32
    return %c0_i32, %c0_i32_0 : i32, i32
  }
  func.func @transform_5(%arg0: i32) -> (i32, i32) {
    %c0_i32 = arith.constant 0 : i32
    %c0_i32_0 = arith.constant 0 : i32
    return %arg0, %c0_i32 : i32, i32
  }
}

</mosaic_0001>

<bundles_post_ra>
// kernel: tpu_custom_call.1
= control target key start
LH: loop header
LB: loop body
LE: loop exit
PB: predicated region body
PF: predicated region fallthrough
CT: control target
= control target key end

     0   :  { %s524_s18 = smov 0   ;;  %s584_s0 = inlined_call_operand.vmem [shape: f32[32,32], index: 0, kind: input, shape index: {}]   ;;  %s585_s1 = inlined_call_operand.vmem [shape: bf16[32,128], index: 1, kind: input, shape index: {}]   ;;  %s586_s2 = inlined_call_operand.vmem [shape: f32[1,128], index: 2, kind: input, shape index: {}]   ;;  %s587_s3 = inlined_call_operand.vmem [shape: bf16[128,16], index: 3, kind: input, shape index: {}]   ;;  %s588_s4 = inlined_call_operand.vmem [shape: f32[1,16], index: 4, kind: input, shape index: {}]   ;;  %s589_s5 = inlined_call_operand.vmem [shape: f32[32,16], index: 5, kind: output, shape index: {}]  }
   0x1 LB: > { %s414_s19 = sadd.s32 4294967295, %s492_s18   ;;  %p418_p0 = scmp.ge.s32.totalorder %s492_s18, 1  ;;  %s492_s18 = sphi %s524_s18, %s15_s18  }
   0x2   : > { %p188_p1 = scmp.lt.s32.totalorder %s492_s18, 3 }
   0x4   : > { %p189_p2 = pnand %p418_p0, %p188_p1 }
   0x5   : > { %s419_s22 = sshll.u32 (!%p189_p2), %s414_s19, 1 }
   0x6   : > { %192 = sbr.rel (%p189_p2) target bundleno = 296 (0x128), region = 40  ;;  %p217_p3 = scmp.lt.s32.totalorder (!%p189_p2), %s419_s22, 3 }
   0xb   : > { %v467_v0 = vld [vmem:[%s585_s1 + $0x8] sm:$0xff]  ;;  %v475_v1 = vld [vmem:[%s587_s3 + $0x38] sm:$0xff]  ;;  %v466_v2 = vld [vmem:[%s585_s1] sm:$0xff]  ;;  %s591_s22 = smov (!%p217_p3, %s419_s22), 3  ;;  %vm252_vm0 = vcmask 261120   ;;  %vm355_vm1 = vcmask 130048  }
   0xc   : > { %262 = vmatpush.bf16.msra.mxu0 %v467_v0  ;;  %341 = vmatpush.bf16.msra.mxu1 %v475_v1  ;;  %v474_v3 = vld [vmem:[%s587_s3 + $0x30] sm:$0xff]  ;;  %s420_s29 = sshll.u32 %s591_s22, 3  ;;  %v473_v4 = vld [vmem:[%s587_s3 + $0x28] sm:$0xff]  ;;  %v472_v8 = vld [vmem:[%s587_s3 + $0x20] sm:$0xff] }
   0xd   : > { %s220_s7 = scalar_lea.vmem %s584_s0, %s420_s29  ;;  %v471_v9 = vld [vmem:[%s587_s3 + $0x18] sm:$0xff]  ;;  %v470_v10 = vld [vmem:[%s587_s3 + $0x10] sm:$0xff]  ;;  %v469_v11 = vld [vmem:[%s587_s3 + $0x8] sm:$0xff]  ;;  %s226_s28 = scalar_lea.vmem %s589_s5, %s420_s29 }
   0xe   : > { %v229_v5 = vld [vmem:[%s220_s7] sm:$0xff]  ;;  %v230_v6 = vld [vmem:[%s220_s7 + $0x8] sm:$0xff] }
   0xf   : > { %v231_v7 = vpack.c.bf16 %v230_v6, %v229_v5  ;;  %v468_v12 = vld [vmem:[%s587_s3] sm:$0xff] }
  0x10   : > { %263 = vmatpush.bf16.msra.mxu0 %v466_v2  ;;  %342 = vmatpush.bf16.msra.mxu1 %v474_v3  ;;  %v484_v14 = vld [vmem:[%s586_s2] ss:$0 sm:$0xff] }
  0x11   : > { %v485_v21 = vld [vmem:[%s588_s4] ss:$0 sm:$0xff] }
  0x13   : > { %431 = vmatmul.msk.bf16.vlgmr.msra.gmra.mxu0 %vm252_vm0, %v231_v7 }
  0x14   : > { %343 = vmatpush.bf16.msra.mxu1 %v473_v4 }
  0x18   : > { %344 = vmatpush.bf16.msra.mxu1 %v472_v8 }
  0x1c   : > { %345 = vmatpush.bf16.msra.mxu1 %v471_v9 }
  0x20   : > { %346 = vmatpush.bf16.msra.mxu1 %v470_v10 }
  0x24   : > { %347 = vmatpush.bf16.msra.mxu1 %v469_v11 }
  0x28   : > { %348 = vmatpush.bf16.msra.mxu1 %v468_v12 }
  0x90   : > { %v265_v13 = vpop.f32.mrf.mxu0 }
  0x91   : > { %v266_v15 = vadd.f32 %v484_v14, %v265_v13 }
  0x93   : > { %v270_v18 = vmax.f32 %v266_v15, 0.0 }
  0x98   : > { %v267_v16 = vpop.f32.mrf.mxu0 }
  0x99   : > { %v268_v17 = vadd.f32 %v484_v14, %v267_v16 }
  0x9b   : > { %v271_v19 = vmax.f32 %v268_v17, 0.0 }
  0x9d   : > { %v272_v20 = vpack.c.bf16 %v271_v19, %v270_v18 }
  0x9f   : > { %349 = vmatmul.bf16.vlgmr.msra.gmra.mxu1 %v272_v20 }
 0x11c   : > { %v350_v22 = vpop.f32.mrf.mxu1 }
 0x11d   : > { %v351_v23 = vadd.f32 %v485_v21, %v350_v22 }
 0x11f   : > { %356 = vst.msk [vmem:[%s226_s28] sm:$0xff] %vm355_vm1, %v351_v23 }
 0x124   : > { %v352_v24 = vpop.f32.mrf.mxu1 }
 0x125   : > { %v353_v25 = vadd.f32 %v485_v21, %v352_v24 }
 0x127   : > { %357 = vst.msk [vmem:[%s226_s28 + $0x8] sm:$0xff] %vm355_vm1, %v353_v25 }
 0x128 PF: > { %s15_s18 = sadd.s32 1, %s492_s18  }
 0x129   : > { %p12_p4 = scmp.ge.s32.totalorder %s15_s18, 4  }
 0x12b   :  { %14 = sbr.rel (!%p12_p4) target bundleno = 1 (0x1), region = 70 }

</bundles_post_ra>
